<compile_context>
chip_gen: v6e
topology: v6e:2x2x1
jax: 0.10.0
libtpu: 0.0.40
codegen_flags: <defaults>
</compile_context>

<pallas_src>
import jax
import jax.numpy as jnp
from jax.experimental import pallas as pl
from jax.experimental.pallas import tpu as pltpu

_LANE = 128
_SUBLANE = 8


def _round_up(x, m):
    return (x + m - 1) // m * m


def reward_model_kernel(x_ref, w1_ref, b1_ref, w2_ref, b2_ref, o_ref):
    # x_ref : (Bt, D)  VMEM, streamed per grid step (double-buffered)
    # w1_ref: (H, D)   VMEM, resident (PyTorch [out_features, in_features])
    # b1_ref: (H, 1)   VMEM, resident
    # w2_ref: (H, 1)   VMEM, resident
    # b2_ref: (1, 1)   SMEM scalar
    # o_ref : (1, Bt)  VMEM, lane-dense output row
    x = x_ref[...]

    # Layer 1 on the MXU: contract the feature dim of both operands so the
    # hidden activation comes out transposed as (H, Bt): hidden on sublanes,
    # batch on the lane axis (transpose fused into the matmul, no XLU copy of
    # the big streamed operand).
    h = jax.lax.dot_general(
        w1_ref[...], x,
        dimension_numbers=(((1,), (1,)), ((), ())),
        preferred_element_type=jnp.float32,
    )                                                    # (H, Bt) f32
    h = jnp.maximum(h + b1_ref[...], 0.0)                # bias + ReLU (VPU)

    # Layer 2 (out_features == 1): VPU multiply by the w2 column and reduce
    # across sublanes -> lane-dense (1, Bt) row.  Avoids a [Bt,H]x[H,1] MXU
    # matmul with a single useful output column and a masked 1-lane store.
    out_row = jnp.sum(h * w2_ref[...], axis=0, keepdims=True)   # (1, Bt) f32
    out_row = out_row + b2_ref[0, 0]
    o_ref[...] = out_row.astype(o_ref.dtype)


def _vmem_capacity_bytes():
    try:
        return int(pltpu.get_tpu_info().vmem_capacity_bytes)
    except Exception:
        # Conservative fallback: v7x per-TC physical VMEM (smallest generation).
        return 64 * 1024 * 1024


def _pick_tiling(B, D, H, itemsize, requested_block_b):
    """Padding-aware, generation-aware batch-tile selection."""
    d_pad = _round_up(D, _LANE)          # D=32 still occupies 128 lanes in VMEM
    h_pad = _round_up(H, _SUBLANE)

    vmem_cap = _vmem_capacity_bytes()
    # Explicit scoped-VMEM limit for the compiler: above the 16/32 MiB scoped
    # defaults, comfortably below physical on every generation.
    vmem_limit = min((vmem_cap * 3) // 4, 112 * 1024 * 1024)
    # Budget for the pipelined buffers: half of physical VMEM.
    tile_budget = vmem_cap // 2
    # Resident params (W1, b1, w2); the pipeline still keeps 2 copies of each.
    param_bytes = 2 * itemsize * (h_pad * d_pad + 2 * h_pad * _LANE)
    tile_budget = max(tile_budget - param_bytes, 1 << 20)

    # Per batch-row bytes of the streamed, double-buffered buffers:
    #   x tile row (lane-padded to 128) + (1, Bt) output block (8 sublanes).
    per_row = 2 * itemsize * (d_pad + _SUBLANE)
    rows_cap = max(_LANE, (tile_budget // per_row) // _LANE * _LANE)

    block_b = max(_LANE, (requested_block_b // _LANE) * _LANE)
    block_b = min(block_b, rows_cap)

    # Keep >= 4 grid steps for big batches: v7x's 2 TensorCores each get >= 2
    # steps (parallel-axis split + double-buffer overlap). Harmless on v5e/v6e.
    if B > 4 * _LANE:
        block_b = min(block_b, max(_LANE, _round_up((B + 3) // 4, _LANE)))

    if B <= block_b:
        # Single tile: keep the output row lane-dense (multiple of 128 lanes).
        block_b = _round_up(B, _LANE)

    return block_b, vmem_limit


def reward_model_forward(x, w1, b1, w2, b2, *, block_b=32768):
    """relu(x @ w1.T + b1) @ w2.T + b2, params in PyTorch nn.Linear layout."""
    B, D = x.shape
    H = w1.shape[0]
    assert w1.shape == (H, D)
    assert b1.shape == (H,)
    assert w2.shape == (1, H)
    assert b2.shape == (1,)

    itemsize = x.dtype.itemsize
    block_b, vmem_limit = _pick_tiling(B, D, H, itemsize, block_b)

    b_pad = _round_up(B, block_b)
    if b_pad != B:
        x = jnp.pad(x, ((0, b_pad - B), (0, 0)))

    # Parameters in kernel layout (columns broadcast along the lane axis).
    b1_col = b1.reshape(H, 1)
    w2_col = w2.reshape(H, 1)
    b2_sc = b2.reshape(1, 1)

    # Advisory cost estimate so XLA can schedule surrounding ops sensibly.
    flops = 2 * b_pad * D * H + 3 * b_pad * H
    bytes_accessed = (b_pad * D + b_pad + H * D + 2 * H + 1) * itemsize

    grid = (b_pad // block_b,)
    out_row = pl.pallas_call(
        reward_model_kernel,
        grid=grid,
        out_shape=jax.ShapeDtypeStruct((1, b_pad), x.dtype),
        in_specs=[
            # Streamed, double-buffered batch tile of x.
            pl.BlockSpec((block_b, D), lambda i: (i, 0)),
            # Parameters: same block every grid step -> resident in VMEM.
            pl.BlockSpec((H, D), lambda i: (0, 0)),
            pl.BlockSpec((H, 1), lambda i: (0, 0)),
            pl.BlockSpec((H, 1), lambda i: (0, 0)),
            # Scalar bias in SMEM (no VMEM DMA / vreg broadcast for one scalar).
            pl.BlockSpec(memory_space=pltpu.MemorySpace.SMEM),
        ],
        out_specs=pl.BlockSpec((1, block_b), lambda i: (0, i)),
        compiler_params=pltpu.CompilerParams(
            # Batch tiles are independent: shards across the 2 TCs on v7x,
            # neutral on single-TC v5e/v6e.
            dimension_semantics=("parallel",),
            vmem_limit_bytes=vmem_limit,
        ),
        cost_estimate=pl.CostEstimate(
            flops=flops, transcendentals=0, bytes_accessed=bytes_accessed),
    )(x, w1, b1_col, w2_col, b2_sc)

    return out_row.reshape(-1)[:B].reshape(B, 1)


def init_params(key, input_dim, hidden_dim, dtype=jnp.float32):
    # PyTorch nn.Linear default init: U(-1/sqrt(fan_in), 1/sqrt(fan_in)),
    # weights stored as [out_features, in_features].
    k1, k2, k3, k4 = jax.random.split(key, 4)
    bound1 = 1.0 / (input_dim ** 0.5)
    bound2 = 1.0 / (hidden_dim ** 0.5)
    w1 = jax.random.uniform(k1, (hidden_dim, input_dim), dtype, -bound1, bound1)
    b1 = jax.random.uniform(k2, (hidden_dim,), dtype, -bound1, bound1)
    w2 = jax.random.uniform(k3, (1, hidden_dim), dtype, -bound2, bound2)
    b2 = jax.random.uniform(k4, (1,), dtype, -bound2, bound2)
    return w1, b1, w2, b2


if __name__ == "__main__":
    # Small demo shapes: tiny feature dims as in the original reward head; a
    # batch that is not a multiple of 128 to exercise the pad-then-slice path.
    B, INPUT_DIM, HIDDEN_DIM = 300, 32, 32

    key = jax.random.PRNGKey(0)
    k_x, k_p = jax.random.split(key)
    x = jax.random.normal(k_x, (B, INPUT_DIM), jnp.float32)
    w1, b1, w2, b2 = init_params(k_p, INPUT_DIM, HIDDEN_DIM)

    # Pure-JAX reference of the PyTorch forward (Linear -> ReLU -> Linear).
    ref = jnp.maximum(x @ w1.T + b1, 0.0) @ w2.T + b2

    # Default (large) tile -> single lane-dense tile at this small batch.
    out = jax.block_until_ready(reward_model_forward(x, w1, b1, w2, b2))
    assert out.shape == (B, 1)
    assert jnp.allclose(out, ref, atol=1e-4, rtol=1e-3)

    # Small explicit tile -> exercises the multi-step grid + padding path.
    out_tiled = jax.block_until_ready(
        reward_model_forward(x, w1, b1, w2, b2, block_b=128))
    assert out_tiled.shape == (B, 1)
    assert jnp.allclose(out_tiled, ref, atol=1e-4, rtol=1e-3)

    print("KERNEL_OK")
</pallas_src>

<mosaic_0001>
module attributes {stable_mosaic.version = 11 : i64} {
  func.func @reward_model_kernel(%arg0: i32, %arg1: memref<384x32xf32, #tpu.memory_space<vmem>>, %arg2: memref<32x32xf32, #tpu.memory_space<vmem>>, %arg3: memref<32x1xf32, #tpu.memory_space<vmem>>, %arg4: memref<32x1xf32, #tpu.memory_space<vmem>>, %arg5: memref<1x1xf32, #tpu.memory_space<smem>>, %arg6: memref<1x384xf32, #tpu.memory_space<vmem>>) attributes {dimension_semantics = [#tpu.dimension_semantics<parallel>], iteration_bounds = array<i64: 1>, scalar_prefetch = 0 : i64, scratch_operands = 0 : i64, tpu.core_type = #tpu.core_type<tc>, window_params = [{transform_indices = @transform_0, window_bounds = array<i64: 384, 32>}, {pipeline_mode = #tpu.pipeline_mode<synchronous>, transform_indices = @transform_1, window_bounds = array<i64: 32, 32>}, {pipeline_mode = #tpu.pipeline_mode<synchronous>, transform_indices = @transform_2, window_bounds = array<i64: 32, 1>}, {pipeline_mode = #tpu.pipeline_mode<synchronous>, transform_indices = @transform_3, window_bounds = array<i64: 32, 1>}, {transform_indices = @transform_4, window_bounds = array<i64: 1, 1>}, {transform_indices = @transform_5, window_bounds = array<i64: 1, 384>}]} {
    %c0 = arith.constant 0 : index
    %c0_0 = arith.constant 0 : index
    %0 = vector.load %arg1[%c0, %c0_0] : memref<384x32xf32, #tpu.memory_space<vmem>>, vector<384x32xf32>
    %c0_1 = arith.constant 0 : index
    %c0_2 = arith.constant 0 : index
    %1 = vector.load %arg2[%c0_1, %c0_2] : memref<32x32xf32, #tpu.memory_space<vmem>>, vector<32x32xf32>
    %cst = arith.constant dense<0.000000e+00> : vector<32x384xf32>
    %2 = tpu.matmul %1, %0, %cst {dimension_numbers = #tpu.dot_dimension_numbers<[1], [1], [0], [0], [0, 0, 1, 0], [], []>} : vector<32x32xf32>, vector<384x32xf32>, vector<32x384xf32> -> vector<32x384xf32>
    %c0_3 = arith.constant 0 : index
    %c0_4 = arith.constant 0 : index
    %3 = vector.load %arg3[%c0_3, %c0_4] : memref<32x1xf32, #tpu.memory_space<vmem>>, vector<32x1xf32>
    %4 = vector.broadcast %3 : vector<32x1xf32> to vector<32x384xf32>
    %5 = arith.addf %2, %4 : vector<32x384xf32>
    %cst_5 = arith.constant 0.000000e+00 : f32
    %6 = vector.broadcast %cst_5 : f32 to vector<32x384xf32>
    %7 = arith.maximumf %5, %6 : vector<32x384xf32>
    %c0_6 = arith.constant 0 : index
    %c0_7 = arith.constant 0 : index
    %8 = vector.load %arg4[%c0_6, %c0_7] : memref<32x1xf32, #tpu.memory_space<vmem>>, vector<32x1xf32>
    %9 = vector.broadcast %8 : vector<32x1xf32> to vector<32x384xf32>
    %10 = arith.mulf %7, %9 : vector<32x384xf32>
    %cst_8 = arith.constant dense<0.000000e+00> : vector<384xf32>
    %11 = vector.multi_reduction <add>, %10, %cst_8 [0] : vector<32x384xf32> to vector<384xf32>
    %12 = vector.shape_cast %11 : vector<384xf32> to vector<1x384xf32>
    %c0_9 = arith.constant 0 : index
    %c0_10 = arith.constant 0 : index
    %13 = memref.load %arg5[%c0_9, %c0_10] : memref<1x1xf32, #tpu.memory_space<smem>>
    %14 = vector.broadcast %13 : f32 to vector<1x384xf32>
    %15 = arith.addf %12, %14 : vector<1x384xf32>
    %c0_11 = arith.constant 0 : index
    %c0_12 = arith.constant 0 : index
    %16 = vector.load %arg6[%c0_11, %c0_12] : memref<1x384xf32, #tpu.memory_space<vmem>>, vector<1x384xf32>
    tpu.vector_store %arg6[%c0_11, %c0_12], %15 {strides = array<i32>} : memref<1x384xf32, #tpu.memory_space<vmem>>, vector<1x384xf32>,
    return
  }
  func.func @transform_0(%arg0: i32) -> (i32, i32) {
    %c0_i32 = arith.constant 0 : i32
    %c0_i32_0 = arith.constant 0 : i32
    return %arg0, %c0_i32 : i32, i32
  }
  func.func @transform_1(%arg0: i32) -> (i32, i32) {
    %c0_i32 = arith.constant 0 : i32
    %c0_i32_0 = arith.constant 0 : i32
    %c0_i32_1 = arith.constant 0 : i32
    return %c0_i32, %c0_i32_0 : i32, i32
  }
  func.func @transform_2(%arg0: i32) -> (i32, i32) {
    %c0_i32 = arith.constant 0 : i32
    %c0_i32_0 = arith.constant 0 : i32
    %c0_i32_1 = arith.constant 0 : i32
    return %c0_i32, %c0_i32_0 : i32, i32
  }
  func.func @transform_3(%arg0: i32) -> (i32, i32) {
    %c0_i32 = arith.constant 0 : i32
    %c0_i32_0 = arith.constant 0 : i32
    %c0_i32_1 = arith.constant 0 : i32
    return %c0_i32, %c0_i32_0 : i32, i32
  }
  func.func @transform_4(%arg0: i32) -> (i32, i32) {
    %c0_i32 = arith.constant 0 : i32
    %c0_i32_0 = arith.constant 0 : i32
    %c0_i32_1 = arith.constant 0 : i32
    return %c0_i32, %c0_i32_0 : i32, i32
  }
  func.func @transform_5(%arg0: i32) -> (i32, i32) {
    %c0_i32 = arith.constant 0 : i32
    %c0_i32_0 = arith.constant 0 : i32
    return %c0_i32, %arg0 : i32, i32
  }
}

</mosaic_0001>

<bundles_post_ra>
// kernel: tpu_custom_call.1
= control target key start
LH: loop header
LB: loop body
LE: loop exit
PB: predicated region body
PF: predicated region fallthrough
CT: control target
= control target key end

     0   :  { %vm98_vm0 = vcmask 261120   ;;  %v736_v8 = vmov 0   ;;  %s1036_s0 = inlined_call_operand.vmem [shape: f32[384,32], index: 0, kind: input, shape index: {}]   ;;  %s1037_s1 = inlined_call_operand.vmem [shape: f32[32,32], index: 1, kind: input, shape index: {}]   ;;  %s1038_s2 = inlined_call_operand.vmem [shape: f32[32,1], index: 2, kind: input, shape index: {}]   ;;  %s1039_s3 = inlined_call_operand.vmem [shape: f32[32,1], index: 3, kind: input, shape index: {}]   ;;  %s1040_s4 = inlined_call_operand.<no memory space> [shape: f32[1,1], index: 4, kind: input, shape index: {}]   ;;  %s1041_s5 = inlined_call_operand.hbm [shape: f32[1,384], index: 5, kind: output, shape index: {}]  }
   0x1   :  { %v53_v0 = vld [vmem:[%s1036_s0 + $0xf8] sm:$0xff]  ;;  %v52_v3 = vld [vmem:[%s1036_s0 + $0xf0] sm:$0xff]  ;;  %v51_v6 = vld [vmem:[%s1036_s0 + $0xe8] sm:$0xff]  ;;  %712 = vset.pattern.permute.xlu0 %v736_v8  ;;  %713 = vset.pattern.permute.xlu1 %v736_v8 }
   0x2   :  { %v69_v1 = vld [vmem:[%s1036_s0 + $0x178] sm:$0xff]  ;;  %611 = vmatprep.subr.msk.mxu0 %vm98_vm0, %v53_v0  ;;  %v68_v4 = vld [vmem:[%s1036_s0 + $0x170] sm:$0xff]  ;;  %v67_v7 = vld [vmem:[%s1036_s0 + $0x168] sm:$0xff] }
   0x3   :  { %v37_v2 = vld [vmem:[%s1036_s0 + $0x78] sm:$0xff]  ;;  %671 = vmatprep.subr.msk.mxu1 %vm98_vm0, %v69_v1  ;;  %v36_v5 = vld [vmem:[%s1036_s0 + $0x70] sm:$0xff]  ;;  %v35_v9 = vld [vmem:[%s1036_s0 + $0x68] sm:$0xff] }
   0x4   :  { %612 = vmatpush3.xpose.msk.msra.mxu0 %vm98_vm0, %v37_v2  ;;  %672 = vmatpush3.xpose.msk.msra.mxu1 %vm98_vm0, %v69_v1  ;;  %v50_v10 = vld [vmem:[%s1036_s0 + $0xe0] sm:$0xff]  ;;  %v49_v13 = vld [vmem:[%s1036_s0 + $0xd8] sm:$0xff]  ;;  %v48_v16 = vld [vmem:[%s1036_s0 + $0xd0] sm:$0xff] }
   0x5   :  { %613 = vmatprep.subr.msk.mxu0 %vm98_vm0, %v52_v3  ;;  %673 = vmatprep.subr.msk.mxu1 %vm98_vm0, %v68_v4  ;;  %v66_v11 = vld [vmem:[%s1036_s0 + $0x160] sm:$0xff]  ;;  %v65_v14 = vld [vmem:[%s1036_s0 + $0x158] sm:$0xff]  ;;  %v64_v17 = vld [vmem:[%s1036_s0 + $0x150] sm:$0xff] }
   0x6   :  { %v34_v12 = vld [vmem:[%s1036_s0 + $0x60] sm:$0xff]  ;;  %v33_v15 = vld [vmem:[%s1036_s0 + $0x58] sm:$0xff]  ;;  %v76_v20 = vld [vmem:[%s1038_s2 + $0x10] sm:$0xff] }
   0x7   :  { %v841_v18 = vld [vmem:[%s1037_s1] sm:$0xff]  ;;  %v32_v21 = vld [vmem:[%s1036_s0 + $0x50] sm:$0xff]  ;;  %v47_v22 = vld [vmem:[%s1036_s0 + $0xc8] sm:$0xff]  ;;  %90 = vperm.xlu1 %713, %v76_v20  }
   0x8   :  { %614 = vmatpush3.xpose.msk.msra.mxu0 %vm98_vm0, %v36_v5  ;;  %674 = vmatpush3.xpose.msk.msra.mxu1 %vm98_vm0, %v68_v4  ;;  %v74_v19 = vld [vmem:[%s1038_s2] sm:$0xff]  ;;  %v63_v23 = vld [vmem:[%s1036_s0 + $0x148] sm:$0xff] }
   0x9   :  { %615 = vmatprep.subr.msk.mxu0 %vm98_vm0, %v51_v6  ;;  %675 = vmatprep.subr.msk.mxu1 %vm98_vm0, %v67_v7 }
   0xa   :  { %643 = vmatprep.mubr.msk.f32.mxu0 %vm98_vm0, %v841_v18  ;;  %703 = vmatprep.mubr.msk.f32.mxu1 %vm98_vm0, %v841_v18 }
   0xb   :  { %80 = vperm.xlu0 %712, %v74_v19  }
   0xc   :  { %616 = vmatpush3.xpose.msk.msra.mxu0 %vm98_vm0, %v35_v9  ;;  %676 = vmatpush3.xpose.msk.msra.mxu1 %vm98_vm0, %v67_v7 }
   0xd   :  { %617 = vmatprep.subr.msk.mxu0 %vm98_vm0, %v50_v10  ;;  %677 = vmatprep.subr.msk.mxu1 %vm98_vm0, %v66_v11 }
  0x10   :  { %618 = vmatpush3.xpose.msk.msra.mxu0 %vm98_vm0, %v34_v12  ;;  %678 = vmatpush3.xpose.msk.msra.mxu1 %vm98_vm0, %v66_v11 }
  0x11   :  { %619 = vmatprep.subr.msk.mxu0 %vm98_vm0, %v49_v13  ;;  %679 = vmatprep.subr.msk.mxu1 %vm98_vm0, %v65_v14 }
  0x14   :  { %620 = vmatpush3.xpose.msk.msra.mxu0 %vm98_vm0, %v33_v15  ;;  %680 = vmatpush3.xpose.msk.msra.mxu1 %vm98_vm0, %v65_v14 }
  0x15   :  { %621 = vmatprep.subr.msk.mxu0 %vm98_vm0, %v48_v16  ;;  %681 = vmatprep.subr.msk.mxu1 %vm98_vm0, %v64_v17 }
  0x16   :  { %11 = vsyncpa [#allocation4], 0  ;;  %v75_v24 = vld [vmem:[%s1038_s2 + $0x8] sm:$0xff]  ;;  %v77_v25 = vld [vmem:[%s1038_s2 + $0x18] sm:$0xff]  ;;  %s738_s8 = smov [#allocation3]  }
  0x17   :  { %v31_v26 = vld [vmem:[%s1036_s0 + $0x48] sm:$0xff]  ;;  %v46_v27 = vld [vmem:[%s1036_s0 + $0xc0] sm:$0xff]  ;;  %85 = vperm.xlu0 %712, %v75_v24   ;;  %95 = vperm.xlu1 %713, %v77_v25   ;;  %v45_v32 = vld [vmem:[%s1036_s0 + $0xb8] sm:$0xff]  ;;  %s547_s9 = sshll.u32 %s738_s8, 4  ;;  %s548_s9 = int_to_ptr.vmem [resolvable:$true] %s547_s9 }
  0x18   :  { %622 = vmatpush3.xpose.msk.msra.mxu0 %vm98_vm0, %v32_v21  ;;  %682 = vmatpush3.xpose.msk.msra.mxu1 %vm98_vm0, %v64_v17  ;;  %v62_v28 = vld [vmem:[%s1036_s0 + $0x140] sm:$0xff]  ;;  %v442_v30 = vld [vmem:[%s1039_s3 + $0x8] sm:$0xff]  ;;  %v61_v33 = vld [vmem:[%s1036_s0 + $0x138] sm:$0xff]  ;;  %s714_s10 = scalar_lea.vmem %s548_s9, 48  ;;  %s718_s11 = scalar_lea.vmem %s548_s9, 64 }
  0x19   :  { %623 = vmatprep.subr.msk.mxu0 %vm98_vm0, %v47_v22  ;;  %683 = vmatprep.subr.msk.mxu1 %vm98_vm0, %v63_v23  ;;  %v441_v29 = vld [vmem:[%s1039_s3] sm:$0xff]  ;;  %v443_v34 = vld [vmem:[%s1039_s3 + $0x10] sm:$0xff]  ;;  %v444_v35 = vld [vmem:[%s1039_s3 + $0x18] sm:$0xff]  ;;  %p715_p0 = scmp.ne.s32.totalorder %s548_s9, %s714_s10  ;;  %p719_p1 = scmp.lt.s32.totalorder %s548_s9, %s548_s9 }
  0x1a   :  { %v30_v31 = vld [vmem:[%s1036_s0 + $0x40] sm:$0xff]  ;;  %v29_v36 = vld [vmem:[%s1036_s0 + $0x38] sm:$0xff]  ;;  %v44_v37 = vld [vmem:[%s1036_s0 + $0xb0] sm:$0xff]  ;;  %p720_p2 = scmp.lt.s32.totalorder %s718_s11, %s714_s10 }
  0x1b   :  { %447 = vperm.xlu0 %712, %v441_v29   ;;  %452 = vperm.xlu1 %713, %v442_v30   ;;  %v60_v38 = vld [vmem:[%s1036_s0 + $0x130] sm:$0xff]  ;;  %v43_v40 = vld [vmem:[%s1036_s0 + $0xa8] sm:$0xff]  ;;  %v42_v43 = vld [vmem:[%s1036_s0 + $0xa0] sm:$0xff] }
  0x1c   :  { %624 = vmatpush3.xpose.msk.msra.mxu0 %vm98_vm0, %v31_v26  ;;  %684 = vmatpush3.xpose.msk.msra.mxu1 %vm98_vm0, %v63_v23  ;;  %v28_v39 = vld [vmem:[%s1036_s0 + $0x30] sm:$0xff]  ;;  %v59_v41 = vld [vmem:[%s1036_s0 + $0x128] sm:$0xff]  ;;  %v58_v44 = vld [vmem:[%s1036_s0 + $0x120] sm:$0xff]  ;;  %p721_p3 = por %p720_p2, %p719_p1 }
  0x1d   :  { %625 = vmatprep.subr.msk.mxu0 %vm98_vm0, %v46_v27  ;;  %685 = vmatprep.subr.msk.mxu1 %vm98_vm0, %v62_v28  ;;  %v27_v42 = vld [vmem:[%s1036_s0 + $0x28] sm:$0xff]  ;;  %v26_v45 = vld [vmem:[%s1036_s0 + $0x20] sm:$0xff]  ;;  %v41_v46 = vld [vmem:[%s1036_s0 + $0x98] sm:$0xff] }
  0x1e   :  { %v57_v47 = vld [vmem:[%s1036_s0 + $0x118] sm:$0xff]  ;;  %v40_v49 = vld [vmem:[%s1036_s0 + $0x90] sm:$0xff]  ;;  %v39_v52 = vld [vmem:[%s1036_s0 + $0x88] sm:$0xff]  ;;  %p722_p4 = pnand %p721_p3, %p715_p0 }
  0x1f   :  { %457 = vperm.xlu0 %712, %v443_v34   ;;  %462 = vperm.xlu1 %713, %v444_v35   ;;  %v25_v48 = vld [vmem:[%s1036_s0 + $0x18] sm:$0xff]  ;;  %v56_v50 = vld [vmem:[%s1036_s0 + $0x110] sm:$0xff]  ;;  %v55_v53 = vld [vmem:[%s1036_s0 + $0x108] sm:$0xff] }
  0x20   :  { %626 = vmatpush3.xpose.msk.msra.mxu0 %vm98_vm0, %v30_v31  ;;  %686 = vmatpush3.xpose.msk.msra.mxu1 %vm98_vm0, %v62_v28  ;;  %v24_v51 = vld [vmem:[%s1036_s0 + $0x10] sm:$0xff]  ;;  %v23_v54 = vld [vmem:[%s1036_s0 + $0x8] sm:$0xff]  ;;  %v38_v55 = vld [vmem:[%s1036_s0 + $0x80] sm:$0xff] }
  0x21   :  { %627 = vmatprep.subr.msk.mxu0 %vm98_vm0, %v45_v32  ;;  %687 = vmatprep.subr.msk.mxu1 %vm98_vm0, %v61_v33  ;;  %v54_v56 = vld [vmem:[%s1036_s0 + $0x100] sm:$0xff]  ;;  %v71_v58 = vld [vmem:[%s1037_s1 + $0x8] sm:$0xff]  ;;  %v72_v59 = vld [vmem:[%s1037_s1 + $0x10] sm:$0xff] }
  0x22   :  { %v22_v57 = vld [vmem:[%s1036_s0] sm:$0xff]  ;;  %v73_v60 = vld [vmem:[%s1037_s1 + $0x18] sm:$0xff] }
  0x24   :  { %628 = vmatpush3.xpose.msk.msra.mxu0 %vm98_vm0, %v29_v36  ;;  %688 = vmatpush3.xpose.msk.msra.mxu1 %vm98_vm0, %v61_v33 }
  0x25   :  { %629 = vmatprep.subr.msk.mxu0 %vm98_vm0, %v44_v37  ;;  %689 = vmatprep.subr.msk.mxu1 %vm98_vm0, %v60_v38 }
  0x28   :  { %630 = vmatpush3.xpose.msk.msra.mxu0 %vm98_vm0, %v28_v39  ;;  %690 = vmatpush3.xpose.msk.msra.mxu1 %vm98_vm0, %v60_v38 }
  0x29   :  { %631 = vmatprep.subr.msk.mxu0 %vm98_vm0, %v43_v40  ;;  %691 = vmatprep.subr.msk.mxu1 %vm98_vm0, %v59_v41 }
  0x2c   :  { %632 = vmatpush3.xpose.msk.msra.mxu0 %vm98_vm0, %v27_v42  ;;  %692 = vmatpush3.xpose.msk.msra.mxu1 %vm98_vm0, %v59_v41 }
  0x2d   :  { %633 = vmatprep.subr.msk.mxu0 %vm98_vm0, %v42_v43  ;;  %693 = vmatprep.subr.msk.mxu1 %vm98_vm0, %v58_v44 }
  0x30   :  { %634 = vmatpush3.xpose.msk.msra.mxu0 %vm98_vm0, %v26_v45  ;;  %694 = vmatpush3.xpose.msk.msra.mxu1 %vm98_vm0, %v58_v44 }
  0x31   :  { %635 = vmatprep.subr.msk.mxu0 %vm98_vm0, %v41_v46  ;;  %695 = vmatprep.subr.msk.mxu1 %vm98_vm0, %v57_v47 }
  0x34   :  { %636 = vmatpush3.xpose.msk.msra.mxu0 %vm98_vm0, %v25_v48  ;;  %696 = vmatpush3.xpose.msk.msra.mxu1 %vm98_vm0, %v57_v47 }
  0x35   :  { %637 = vmatprep.subr.msk.mxu0 %vm98_vm0, %v40_v49  ;;  %697 = vmatprep.subr.msk.mxu1 %vm98_vm0, %v56_v50 }
  0x38   :  { %638 = vmatpush3.xpose.msk.msra.mxu0 %vm98_vm0, %v24_v51  ;;  %698 = vmatpush3.xpose.msk.msra.mxu1 %vm98_vm0, %v56_v50 }
  0x39   :  { %639 = vmatprep.subr.msk.mxu0 %vm98_vm0, %v39_v52  ;;  %699 = vmatprep.subr.msk.mxu1 %vm98_vm0, %v55_v53 }
  0x3c   :  { %640 = vmatpush3.xpose.msk.msra.mxu0 %vm98_vm0, %v23_v54  ;;  %700 = vmatpush3.xpose.msk.msra.mxu1 %vm98_vm0, %v55_v53 }
  0x3d   :  { %641 = vmatprep.subr.msk.mxu0 %vm98_vm0, %v38_v55  ;;  %701 = vmatprep.subr.msk.mxu1 %vm98_vm0, %v54_v56 }
  0x40   :  { %642 = vmatpush3.xpose.msk.msra.mxu0 %vm98_vm0, %v22_v57  ;;  %702 = vmatpush3.xpose.msk.msra.mxu1 %vm98_vm0, %v54_v56 }
  0x43   :  { %644 = vmatmul.mubr.msk.f32.vlgmr.msra.gmra.mxu0 %vm98_vm0, %v841_v18  ;;  %704 = vmatmul.mubr.msk.f32.vlgmr.msra.gmra.mxu1 %vm98_vm0, %v71_v58 }
  0x44   :  { %645 = vmatprep.mubr.msk.f32.mxu0 %vm98_vm0, %v71_v58  ;;  %706 = vmatprep.mubr.msk.f32.mxu1 %vm98_vm0, %v72_v59 }
  0x47   :  { %646 = vmatmul.mubr.msk.f32.gmra.mxu0 %vm98_vm0, %v71_v58  ;;  %707 = vmatmul.mubr.msk.f32.gmra.mxu1 %vm98_vm0, %v73_v60 }
  0x48   :  { %647 = vmatprep.mubr.msk.f32.mxu0 %vm98_vm0, %v72_v59 }
  0x4b   :  { %648 = vmatmul.mubr.msk.f32.gmra.mxu0 %vm98_vm0, %v72_v59 }
  0x4c   :  { %649 = vmatprep.mubr.msk.f32.mxu0 %vm98_vm0, %v73_v60 }
  0x4f   :  { %650 = vmatmul.mubr.msk.f32.gmra.mxu0 %vm98_vm0, %v73_v60 }
  0x82   :  { %v91_v62 = vpop.permute.xlu1 %90 }
  0x86   :  { %v81_v61 = vpop.permute.xlu0 %80 }
  0x92   :  { %v86_v63 = vpop.permute.xlu0 %85  ;;  %v96_v0 = vpop.permute.xlu1 %95 }
  0x96   :  { %v448_v6 = vpop.permute.xlu0 %447  ;;  %v453_v11 = vpop.permute.xlu1 %452 }
  0x9a   :  { %v458_v31 = vpop.permute.xlu0 %457  ;;  %v463_v38 = vpop.permute.xlu1 %462 }
 0x103   :  { %v321_v1 = vpop.f32.mrf.mxu0  ;;  %v705_v2 = vpop.f32.mrf.mxu1 }
 0x104   :  { %v416_v3 = vadd.f32 %v705_v2, %v86_v63  ;;  %v322_v13 = vadd.f32 %v321_v1, %v81_v61 }
 0x105   :  { %v323_v4 = vpop.f32.mrf.mxu0  ;;  %v410_v5 = vpop.f32.mrf.mxu1 }
 0x106   :  { %v434_v7 = vmax.f32 %v416_v3, 0.0  ;;  %v411_v8 = vadd.f32 %v410_v5, %v81_v61  ;;  %v324_v14 = vadd.f32 %v323_v4, %v81_v61  ;;  %v429_v29 = vmax.f32 %v322_v13, 0.0 }
 0x107   :  { %v327_v9 = vpop.f32.mrf.mxu0  ;;  %v708_v10 = vpop.f32.mrf.mxu1 }
 0x108   :  { %v431_v12 = vmax.f32 %v411_v8, 0.0  ;;  %v328_v15 = vadd.f32 %v327_v9, %v86_v63  ;;  %v426_v16 = vadd.f32 %v708_v10, %v96_v0  ;;  %v470_v19 = vmul.f32 %v453_v11, %v434_v7 }
 0x109   :  { %v329_v17 = vpop.f32.mrf.mxu0  ;;  %v420_v18 = vpop.f32.mrf.mxu1  ;;  %v430_v30 = vmax.f32 %v324_v14, 0.0  ;;  %v465_v44 = vmul.f32 %v448_v6, %v429_v29  ;;  %v737_v9 = vmov 1966171168  }
 0x10a   :  { %v467_v20 = vmul.f32 %v448_v6, %v431_v12  ;;  %v330_v21 = vadd.f32 %v329_v17, %v86_v63  ;;  %v421_v22 = vadd.f32 %v420_v18, %v91_v62  ;;  %v432_v23 = vmax.f32 %v328_v15, 0.0 }
 0x10b   :  { %v333_v24 = vpop.f32.mrf.mxu0  ;;  %v440_v25 = vmax.f32 %v426_v16, 0.0  ;;  %v466_v48 = vmul.f32 %v448_v6, %v430_v30  ;;  %v514_v10 = vunpack.c.l.s4 %v737_v9 }
 0x10c   :  { %v433_v26 = vmax.f32 %v330_v21, 0.0  ;;  %v437_v27 = vmax.f32 %v421_v22, 0.0  ;;  %v334_v28 = vadd.f32 %v333_v24, %v91_v62  ;;  %v495_v33 = vadd.f32 %v470_v19, %v467_v20 }
 0x10d   :  { %v335_v32 = vpop.f32.mrf.mxu0  ;;  %v468_v37 = vmul.f32 %v453_v11, %v432_v23  ;;  %v476_v40 = vmul.f32 %v463_v38, %v440_v25  ;;  %v515_v17 = vunpack.c.0.s8 %v514_v10  ;;  %v505_v20 = vstv %s1040_s4 }
 0x10e   :  { %v473_v34 = vmul.f32 %v458_v31, %v437_v27  ;;  %v435_v35 = vmax.f32 %v334_v28, 0.0  ;;  %v336_v36 = vadd.f32 %v335_v32, %v91_v62  ;;  %v469_v41 = vmul.f32 %v453_v11, %v433_v26 }
 0x10f   :  { %v339_v39 = vpop.f32.mrf.mxu0  ;;  %v477_v52 = vadd.f32 %v468_v37, %v465_v44  ;;  %v516_v11 = vlaneseq }
 0x110   :  { %v496_v42 = vadd.f32 %v495_v33, %v473_v34  ;;  %v436_v43 = vmax.f32 %v336_v36, 0.0  ;;  %v471_v45 = vmul.f32 %v458_v31, %v435_v35  ;;  %v340_v46 = vadd.f32 %v339_v39, %v96_v0 }
 0x111   :  { %v341_v47 = vpop.f32.mrf.mxu0  ;;  %v486_v54 = vadd.f32 %v469_v41, %v466_v48  ;;  %v517_v18 = vshrl.u32 %v516_v11, 7  ;;  %vm538_vm1 = vcmp.lt.s32.totalorder %v516_v11, 384 }
 0x112   :  { %v497_v49 = vadd.f32 %v496_v42, %v476_v40  ;;  %v472_v50 = vmul.f32 %v458_v31, %v436_v43  ;;  %v342_v51 = vadd.f32 %v341_v47, %v96_v0  ;;  %v438_v53 = vmax.f32 %v340_v46, 0.0 }
 0x113   :  { %v478_v57 = vadd.f32 %v477_v52, %v471_v45  ;;  %v518_v25 = vsub.s32 %v515_v17, %v517_v18 }
 0x114   :  { %v498_v55 = vrot.slane %v497_v49, 4  ;;  %v439_v56 = vmax.f32 %v342_v51, 0.0  ;;  %v474_v58 = vmul.f32 %v463_v38, %v438_v53  ;;  %v487_v60 = vadd.f32 %v486_v54, %v472_v50 }
 0x116   :  { %v499_v59 = vadd.f32 %v498_v55, %v497_v49  ;;  %v475_v61 = vmul.f32 %v463_v38, %v439_v56  ;;  %v479_v62 = vadd.f32 %v478_v57, %v474_v58 }
 0x118   :  { %v500_v63 = vrot.slane %v499_v59, 2  ;;  %v488_v1 = vadd.f32 %v487_v60, %v475_v61  ;;  %v480_v2 = vrot.slane %v479_v62, 4 }
 0x11a   :  { %v501_v3 = vadd.f32 %v500_v63, %v499_v59  ;;  %v489_v4 = vrot.slane %v488_v1, 4  ;;  %v481_v5 = vadd.f32 %v480_v2, %v479_v62 }
 0x11c   :  { %v490_v6 = vadd.f32 %v489_v4, %v488_v1  ;;  %v482_v7 = vrot.slane %v481_v5, 2  ;;  %v502_v0 = vrot.slane %v501_v3, 1 }
 0x11e   :  { %v491_v8 = vrot.slane %v490_v6, 2  ;;  %v483_v12 = vadd.f32 %v482_v7, %v481_v5  ;;  %v503_v16 = vadd.f32 %v502_v0, %v501_v3 }
 0x120   :  { %v492_v13 = vadd.f32 %v491_v8, %v490_v6  ;;  %v484_v14 = vrot.slane %v483_v12, 1  ;;  %v508_v24 = vadd.f32 %v505_v20, %v503_v16 }
 0x122   :  { %v493_v15 = vrot.slane %v492_v13, 1  ;;  %v485_v19 = vadd.f32 %v484_v14, %v483_v12  ;;  %v526_v28 = vrot.slane %v508_v24, %v518_v25 }
 0x124   :  { %v494_v21 = vadd.f32 %v493_v15, %v492_v13  ;;  %v506_v22 = vadd.f32 %v505_v20, %v485_v19 }
 0x126   :  { %v507_v23 = vadd.f32 %v505_v20, %v494_v21 }
 0x128   :  { %v512_v26 = vcombine.low %v506_v22, %v507_v23 }
 0x12a   :  { %v519_v27 = vrot.slane %v512_v26, %v518_v25 }
 0x12c   :  { %v527_v29 = vcombine.low %v519_v27, %v526_v28 }
 0x12e   :  { %v534_v30 = vrot.slane %v527_v29, %v518_v25 }
 0x130   :  { %540 = vst.msk [vmem:[#allocation3] sm:$0x7] %vm538_vm1, %v534_v30 }
 0x131   :  { %725 = shalt.err (!%p722_p4)
}
 0x132   :  { %550 = dma.vmem_to_hbm [thread:$0]  %s548_s9, 48, %s1041_s5, [#allocation4]  }
 0x133   :  { %734 = dma.done.wait [#allocation4], 48  }
 0x134   :  { %735 = vsyncadd [#allocation4], 4294967248 }
 0x135   :  { %554 = vsyncpa [#allocation4], 1 }

</bundles_post_ra>
